<compile_context>
chip_gen: v7x
topology: tpu7x:2x2x1
jax: 0.10.0
libtpu: 0.0.40
codegen_flags: <defaults>
</compile_context>

<pallas_src>
import jax
import jax.numpy as jnp
from jax.experimental import pallas as pl
from jax.experimental.pallas import tpu as pltpu

_LANE = 128


def _target_rows_and_limit():
    """Generation-aware (rows per f32 block, vmem_limit_bytes)."""
    try:
        vmem = pltpu.get_tpu_info().vmem_capacity_bytes
    except Exception:
        vmem = 64 * 1024 * 1024  # conservative (v7x-sized) default
    if vmem >= 96 * 1024 * 1024:   # v5e / v6e: 128 MiB physical VMEM
        block_bytes, limit = 12 * 1024 * 1024, 80 * 1024 * 1024
    else:                          # v7x: 64 MiB per TensorCore
        block_bytes, limit = 8 * 1024 * 1024, 48 * 1024 * 1024
    return block_bytes // (_LANE * 4), limit


def _choose_tiling(batch, n_rows, target_rows):
    """Pick (BB, tr, nb, nt): block = (BB, tr, 128), grid = (nb, nt)."""
    if n_rows >= target_rows:
        # One image per block; split rows into near-equal multiples of 8.
        bb = 1
        nt = pl.cdiv(n_rows, target_rows)
        tr = 8 * pl.cdiv(n_rows, 8 * nt)
        nt = pl.cdiv(n_rows, tr)
    else:
        # Pack several images per block so small images still fill ~target.
        tr = n_rows  # full row extent (may be < 8: allowed when == full dim)
        bb = max(1, min(batch, target_rows // max(n_rows, 1)))
        nt = 1
    nb = pl.cdiv(batch, bb)
    # v7x megacore: avoid a 1-block grid when there is enough data to split.
    if nb * nt == 1 and n_rows >= 16:
        tr = 8 * pl.cdiv(pl.cdiv(n_rows, 2), 8)
        nt = pl.cdiv(n_rows, tr)
    return bb, tr, nb, nt


def _adjust_bc_kernel(scale_ref, offset_ref, x_ref, o_ref):
    # scale_ref / offset_ref: (B,) f32 in SMEM (scalar prefetch).
    # x_ref / o_ref: (BB, tr, 128) tile -- BB packed images x one row tile.
    bi = pl.program_id(0)
    bb = x_ref.shape[0]
    num_images = scale_ref.shape[0]
    for j in range(bb):  # static unroll over the packed images
        # Clamp the scalar index so a partial final batch block never reads
        # SMEM out of bounds (those rows are masked out on writeback anyway).
        idx = jnp.minimum(bi * bb + j, num_images - 1)
        a = scale_ref[idx]
        c = offset_ref[idx]
        o_ref[j] = jnp.clip(x_ref[j] * a + c, 0.0, 1.0).astype(o_ref.dtype)


def adjust_brightness_contrast(imgs, xform_params):
    """imgs: (B, C, H, W) float; xform_params: (B, 2) float [alpha, beta]."""
    b, c, h, w = imgs.shape
    n = c * h * w

    alpha = xform_params[:, 0].astype(jnp.float32)
    beta = xform_params[:, 1].astype(jnp.float32)
    # Folded affine: alpha*(x-0.5)+0.5+beta == alpha*x + (0.5 - 0.5*alpha + beta).
    offset = 0.5 - 0.5 * alpha + beta

    x2d = imgs.reshape(b, n)          # free (metadata only)
    n_main = (n // _LANE) * _LANE     # lane-aligned prefix per image
    tail = n - n_main

    out_parts = []
    if n_main > 0:
        # Zero-copy reshape when aligned; otherwise slice off only the prefix.
        x_main = x2d if tail == 0 else x2d[:, :n_main]
        n_rows = n_main // _LANE
        x3d = x_main.reshape(b, n_rows, _LANE)

        target_rows, vmem_limit = _target_rows_and_limit()
        bb, tr, nb, nt = _choose_tiling(b, n_rows, target_rows)

        out3d = pl.pallas_call(
            _adjust_bc_kernel,
            out_shape=jax.ShapeDtypeStruct((b, n_rows, _LANE), imgs.dtype),
            grid_spec=pltpu.PrefetchScalarGridSpec(
                num_scalar_prefetch=2,
                grid=(nb, nt),
                in_specs=[
                    pl.BlockSpec((bb, tr, _LANE),
                                 lambda bi, ri, scale, off: (bi, ri, 0)),
                ],
                out_specs=pl.BlockSpec((bb, tr, _LANE),
                                       lambda bi, ri, scale, off: (bi, ri, 0)),
            ),
            compiler_params=pltpu.CompilerParams(
                dimension_semantics=("parallel", "parallel"),
                vmem_limit_bytes=vmem_limit,
            ),
        )(alpha, offset, x3d)

        out_main = out3d.reshape(b, n_main)
        if tail == 0:
            return out_main.reshape(b, c, h, w)
        out_parts.append(out_main)

    if tail > 0:
        # <=127 leftover elements per image: trivial jnp epilogue (tiny).
        x_tail = x2d[:, n_main:]
        out_tail = jnp.clip(x_tail * alpha[:, None] + offset[:, None],
                            0.0, 1.0).astype(imgs.dtype)
        out_parts.append(out_tail)

    return jnp.concatenate(out_parts, axis=1).reshape(b, c, h, w)


def init_xform_params(batch):
    """Deterministic init matching the module __init__ (random_init=False):
    alpha = 1.0, beta = 0.0 -> params shape (B, 2)."""
    alpha = jnp.ones((batch, 1), dtype=jnp.float32)
    beta = jnp.zeros((batch, 1), dtype=jnp.float32)
    return jnp.concatenate([alpha, beta], axis=1)


def _reference(imgs, params):
    b = imgs.shape[0]
    a = params[:, 0].reshape(-1, 1)
    bt = params[:, 1].reshape(-1, 1)
    flat = jnp.clip(a * (imgs.reshape(b, -1) - 0.5) + 0.5 + bt, 0.0, 1.0)
    return flat.reshape(imgs.shape)


# TODO(synk): update_and_project_params (sign-SGD step + bound projection on
# the parameters) is an optimizer-side op, not part of the forward pass; not ported.

if __name__ == "__main__":
    key = jax.random.PRNGKey(0)
    k1, k2, k3 = jax.random.split(key, 3)

    # Case 1: lane-aligned (N = 4*16*16 = 1024) -> zero-copy, batch-packed block.
    B, C, H, W = 2, 4, 16, 16
    imgs = jax.random.uniform(k1, (B, C, H, W), dtype=jnp.float32)
    params = init_xform_params(B)
    params = params.at[:, 0].set(jnp.array([1.3, 0.7], dtype=jnp.float32))   # alpha
    params = params.at[:, 1].set(jnp.array([0.2, -0.1], dtype=jnp.float32))  # beta
    out = jax.block_until_ready(adjust_brightness_contrast(imgs, params))
    assert out.shape == (B, C, H, W)
    assert jnp.allclose(out, _reference(imgs, params), atol=1e-6), "mismatch (aligned)"

    # Case 2: non-128-aligned (N = 3*15*15 = 675) -> slab + tiny tail epilogue.
    B2, C2, H2, W2 = 2, 3, 15, 15
    imgs2 = jax.random.uniform(k2, (B2, C2, H2, W2), dtype=jnp.float32)
    params2 = init_xform_params(B2)
    params2 = params2.at[:, 0].set(jnp.array([0.6, 1.4], dtype=jnp.float32))
    params2 = params2.at[:, 1].set(jnp.array([-0.3, 0.25], dtype=jnp.float32))
    out2 = jax.block_until_ready(adjust_brightness_contrast(imgs2, params2))
    assert out2.shape == (B2, C2, H2, W2)
    assert jnp.allclose(out2, _reference(imgs2, params2), atol=1e-6), "mismatch (tail)"

    # Case 3: single image with enough rows to exercise the 2-block megacore
    # split (N = 4*32*64 = 8192 -> 64 rows -> grid (1, 2)).
    B3, C3, H3, W3 = 1, 4, 32, 64
    imgs3 = jax.random.uniform(k3, (B3, C3, H3, W3), dtype=jnp.float32)
    params3 = init_xform_params(B3)
    params3 = params3.at[:, 0].set(jnp.array([1.2], dtype=jnp.float32))
    params3 = params3.at[:, 1].set(jnp.array([-0.15], dtype=jnp.float32))
    out3 = jax.block_until_ready(adjust_brightness_contrast(imgs3, params3))
    assert out3.shape == (B3, C3, H3, W3)
    assert jnp.allclose(out3, _reference(imgs3, params3), atol=1e-6), "mismatch (split)"

    print("KERNEL_OK")
</pallas_src>

<mosaic_0001>
module attributes {stable_mosaic.version = 11 : i64} {
  func.func @_adjust_bc_kernel(%arg0: i32, %arg1: i32, %arg2: memref<2xf32, #tpu.memory_space<smem>>, %arg3: memref<2xf32, #tpu.memory_space<smem>>, %arg4: memref<2x8x128xf32, #tpu.memory_space<vmem>>, %arg5: memref<2x8x128xf32, #tpu.memory_space<vmem>>) attributes {dimension_semantics = [#tpu.dimension_semantics<parallel>, #tpu.dimension_semantics<parallel>], iteration_bounds = array<i64: 1, 1>, scalar_prefetch = 2 : i64, scratch_operands = 0 : i64, tpu.core_type = #tpu.core_type<tc>, window_params = [{transform_indices = @transform_0, window_bounds = array<i64: 2, 8, 128>}, {transform_indices = @transform_1, window_bounds = array<i64: 2, 8, 128>}]} {
    %c2_i32 = arith.constant 2 : i32
    %0 = arith.muli %arg0, %c2_i32 : i32
    %c0_i32 = arith.constant 0 : i32
    %1 = arith.addi %0, %c0_i32 : i32
    %c1_i32 = arith.constant 1 : i32
    %2 = arith.minsi %1, %c1_i32 : i32
    %3 = arith.index_cast %2 : i32 to index
    %4 = memref.load %arg2[%3] : memref<2xf32, #tpu.memory_space<smem>>
    %5 = arith.index_cast %2 : i32 to index
    %6 = memref.load %arg3[%5] : memref<2xf32, #tpu.memory_space<smem>>
    %c0 = arith.constant 0 : index
    %c0_0 = arith.constant 0 : index
    %c0_1 = arith.constant 0 : index
    %7 = vector.load %arg4[%c0, %c0_0, %c0_1] : memref<2x8x128xf32, #tpu.memory_space<vmem>>, vector<1x8x128xf32>
    %8 = vector.shape_cast %7 : vector<1x8x128xf32> to vector<8x128xf32>
    %9 = vector.broadcast %4 : f32 to vector<8x128xf32>
    %10 = arith.mulf %8, %9 : vector<8x128xf32>
    %11 = vector.broadcast %6 : f32 to vector<8x128xf32>
    %12 = arith.addf %10, %11 : vector<8x128xf32>
    %cst = arith.constant 0.000000e+00 : f32
    %cst_2 = arith.constant 1.000000e+00 : f32
    %13 = vector.broadcast %cst : f32 to vector<8x128xf32>
    %14 = arith.maximumf %13, %12 : vector<8x128xf32>
    %15 = vector.broadcast %cst_2 : f32 to vector<8x128xf32>
    %16 = arith.minimumf %15, %14 : vector<8x128xf32>
    %c0_3 = arith.constant 0 : index
    %c0_4 = arith.constant 0 : index
    %c0_5 = arith.constant 0 : index
    %17 = vector.load %arg5[%c0_3, %c0_4, %c0_5] : memref<2x8x128xf32, #tpu.memory_space<vmem>>, vector<1x8x128xf32>
    %18 = vector.shape_cast %17 : vector<1x8x128xf32> to vector<8x128xf32>
    %19 = vector.shape_cast %16 : vector<8x128xf32> to vector<1x8x128xf32>
    tpu.vector_store %arg5[%c0_3, %c0_4, %c0_5], %19 {strides = array<i32>} : memref<2x8x128xf32, #tpu.memory_space<vmem>>, vector<1x8x128xf32>,
    %c2_i32_6 = arith.constant 2 : i32
    %20 = arith.muli %arg0, %c2_i32_6 : i32
    %c1_i32_7 = arith.constant 1 : i32
    %21 = arith.addi %20, %c1_i32_7 : i32
    %c1_i32_8 = arith.constant 1 : i32
    %22 = arith.minsi %21, %c1_i32_8 : i32
    %23 = arith.index_cast %22 : i32 to index
    %24 = memref.load %arg2[%23] : memref<2xf32, #tpu.memory_space<smem>>
    %25 = arith.index_cast %22 : i32 to index
    %26 = memref.load %arg3[%25] : memref<2xf32, #tpu.memory_space<smem>>
    %c1 = arith.constant 1 : index
    %c0_9 = arith.constant 0 : index
    %c0_10 = arith.constant 0 : index
    %27 = vector.load %arg4[%c1, %c0_9, %c0_10] : memref<2x8x128xf32, #tpu.memory_space<vmem>>, vector<1x8x128xf32>
    %28 = vector.shape_cast %27 : vector<1x8x128xf32> to vector<8x128xf32>
    %29 = vector.broadcast %24 : f32 to vector<8x128xf32>
    %30 = arith.mulf %28, %29 : vector<8x128xf32>
    %31 = vector.broadcast %26 : f32 to vector<8x128xf32>
    %32 = arith.addf %30, %31 : vector<8x128xf32>
    %cst_11 = arith.constant 0.000000e+00 : f32
    %cst_12 = arith.constant 1.000000e+00 : f32
    %33 = vector.broadcast %cst_11 : f32 to vector<8x128xf32>
    %34 = arith.maximumf %33, %32 : vector<8x128xf32>
    %35 = vector.broadcast %cst_12 : f32 to vector<8x128xf32>
    %36 = arith.minimumf %35, %34 : vector<8x128xf32>
    %c1_13 = arith.constant 1 : index
    %c0_14 = arith.constant 0 : index
    %c0_15 = arith.constant 0 : index
    %37 = vector.load %arg5[%c1_13, %c0_14, %c0_15] : memref<2x8x128xf32, #tpu.memory_space<vmem>>, vector<1x8x128xf32>
    %38 = vector.shape_cast %37 : vector<1x8x128xf32> to vector<8x128xf32>
    %39 = vector.shape_cast %36 : vector<8x128xf32> to vector<1x8x128xf32>
    tpu.vector_store %arg5[%c1_13, %c0_14, %c0_15], %39 {strides = array<i32>} : memref<2x8x128xf32, #tpu.memory_space<vmem>>, vector<1x8x128xf32>,
    return
  }
  func.func @transform_0(%arg0: i32, %arg1: i32, %arg2: memref<2xf32, #tpu.memory_space<smem>>, %arg3: memref<2xf32, #tpu.memory_space<smem>>) -> (i32, i32, i32) {
    %c0_i32 = arith.constant 0 : i32
    %c0_i32_0 = arith.constant 0 : i32
    return %arg0, %arg1, %c0_i32 : i32, i32, i32
  }
  func.func @transform_1(%arg0: i32, %arg1: i32, %arg2: memref<2xf32, #tpu.memory_space<smem>>, %arg3: memref<2xf32, #tpu.memory_space<smem>>) -> (i32, i32, i32) {
    %c0_i32 = arith.constant 0 : i32
    %c0_i32_0 = arith.constant 0 : i32
    return %arg0, %arg1, %c0_i32 : i32, i32, i32
  }
}

</mosaic_0001>

<bundles_post_ra>
// kernel: tpu_custom_call.1
= control target key start
LH: loop header
LB: loop body
LE: loop exit
PB: predicated region body
PF: predicated region fallthrough
CT: control target
= control target key end

     0   :  { %s229_s0 = inlined_call_operand.hbm [shape: f32[2], index: 0, kind: input, shape index: {}]   ;;  %s230_s2 = inlined_call_operand.hbm [shape: f32[2,8,128], index: 2, kind: input, shape index: {}]   ;;  %s231_s3 = inlined_call_operand.hbm [shape: f32[2,8,128], index: 3, kind: output, shape index: {}]   ;;  %s232_s1 = inlined_call_operand.vmem [shape: f32[2], index: 1, kind: input, shape index: {}]  }
   0x1   :  { %s86_s14 = scalar_lea.hbm %s229_s0, 16 }
   0x2   :  { %p87_p0 = scmp.ne.s32.totalorder %s229_s0, %s86_s14  ;;  %p90_p1 = scmp.lt.u32.totalorder %s86_s14, %s229_s0 }
   0x4   :  { %p92_p2 = pnand %p90_p1, %p87_p0 }
   0x6   :  { %95 = shalt.err (!%p92_p2)  }
   0x7   :  { %s158_s19 = smov [#allocation3]   ;;  %s10_s24 = sshll.u32 %s232_s1, 4  ;;  %s11_s24 = int_to_ptr.vmem [resolvable:$true] %s10_s24 }
   0x8   :  { %9 = dma.hbm_to_smem %s229_s0, 16, %s158_s19, [#allocation2] }
   0x9   :  { %s96_s25 = scalar_lea.vmem %s11_s24, 16  ;;  %p101_p4 = scmp.lt.s32.totalorder %s11_s24, %s11_s24 }
   0xa   :  { %p97_p3 = scmp.ne.s32.totalorder %s11_s24, %s96_s25  ;;  %p102_p5 = scmp.lt.s32.totalorder %s96_s25, %s96_s25 }
   0xc   :  { %p103_p6 = por %p102_p5, %p101_p4 }
   0xe   :  { %p104_p7 = pnand %p103_p6, %p97_p3 }
  0x10   :  { %107 = shalt.err (!%p104_p7)  }
  0x11   :  { %s159_s26 = smov [#allocation4]  }
  0x12   :  { %13 = dma.vmem_to_smem %s11_s24, 16, %s159_s26, [#allocation2] }
  0x13   :  { %152 = dma.done.wait [#allocation2], 32 }
  0x14   :  { %153 = vsyncadd [#allocation2], 4294967264 }
  0x15   :  { %15 = sfence }
  0x16   :  { %16 = vsyncpa [#allocation6], 0 }
  0x17   :  { %17 = vsyncpa [#allocation7], 0  ;;  %s160_s0 = smov [#allocation5]   ;;  %s108_s29 = scalar_lea.hbm %s230_s2, 256 }
  0x18   :  { %s23_s27 = sshll.u32 %s160_s0, 4  ;;  %p109_p8 = scmp.ne.s32.totalorder %s230_s2, %s108_s29  ;;  %s24_s27 = int_to_ptr.vmem [resolvable:$true] %s23_s27 }
  0x19   :  { %p112_p9 = scmp.lt.u32.totalorder %s108_s29, %s230_s2 }
  0x1b   :  { %p114_p10 = pnand %p112_p9, %p109_p8 }
  0x1d   :  { %117 = shalt.err (!%p114_p10)
}
  0x1e   :  { %s118_s7 = scalar_lea.vmem %s24_s27, 256  ;;  %p123_p12 = scmp.lt.s32.totalorder %s24_s27, %s24_s27 }
  0x1f   :  { %p119_p11 = scmp.ne.s32.totalorder %s24_s27, %s118_s7  ;;  %p124_p13 = scmp.lt.s32.totalorder %s118_s7, %s118_s7 }
  0x21   :  { %p125_p0 = por %p124_p13, %p123_p12 }
  0x23   :  { %p126_p1 = pnand %p125_p0, %p119_p11 }
  0x25   :  { %129 = shalt.err (!%p126_p1)
}
  0x26   :  { %s161_s8 = smov 128   ;;  %s162_s9 = smov 8  }
  0x27   :  { %29 = dma.hbm_to_vmem [thread:$0]  %s230_s2, 256, %s24_s27, [#allocation6], %s161_s8, %s161_s8, %s162_s9  }
  0x28   :  { %154 = dma.done.wait [#allocation6], 256  }
  0x29   :  { %155 = vsyncadd [#allocation6], 4294967040  ;;  %s36_s12 = sld [smem:[#allocation3]]  ;;  %s78_s14 = sld [smem:[#allocation3 + $0x1]]  ;;  %v38_v0 = vld [vmem:[#allocation5] sm:$0xff]  ;;  %v52_v3 = vld [vmem:[#allocation5 + $0x8] sm:$0xff] }
  0x2a   :  { %s37_s13 = sld [smem:[#allocation4]]  ;;  %s79_s15 = sld [smem:[#allocation4 + $0x1]] }
  0x2b   :  { %s163_s16 = smov [#allocation8]  }
  0x2c   :  { %s66_s17 = sshll.u32 %s163_s16, 4  ;;  %s67_s17 = int_to_ptr.vmem [resolvable:$true] %s66_s17 }
  0x2d   :  { %s130_s2 = scalar_lea.vmem %s67_s17, 256  ;;  %p135_p3 = scmp.lt.s32.totalorder %s67_s17, %s67_s17 }
  0x2e   :  { %p131_p2 = scmp.ne.s32.totalorder %s67_s17, %s130_s2  ;;  %p136_p4 = scmp.lt.s32.totalorder %s130_s2, %s130_s2 }
  0x2f   :  { %v39_v1 = vstv %s36_s12  ;;  %v53_v5 = vstv %s78_s14 }
  0x30   :  { %v41_v2 = vstv %s37_s13  ;;  %v40_v4 = vmul.f32 %v39_v1, %v38_v0  ;;  %v55_v6 = vstv %s79_s15  ;;  %v54_v7 = vmul.f32 %v53_v5, %v52_v3  ;;  %p137_p5 = por %p136_p4, %p135_p3 }
  0x32   :  { %v42_v8 = vadd.f32 %v41_v2, %v40_v4  ;;  %v56_v9 = vadd.f32 %v55_v6, %v54_v7  ;;  %p138_p6 = pnand %p137_p5, %p131_p2 }
  0x34   :  { %v43_v10 = vmax.f32 %v42_v8, 0.0  ;;  %v57_v11 = vmax.f32 %v56_v9, 0.0 }
  0x36   :  { %v44_v12 = vmin.f32 %v43_v10, 1.0  ;;  %v58_v13 = vmin.f32 %v57_v11, 1.0 }
  0x38   :  { %45 = vst [vmem:[#allocation8] sm:$0xff] %v44_v12  ;;  %60 = vst [vmem:[#allocation8 + $0x8] sm:$0xff] %v58_v13 }
  0x39   :  { %141 = shalt.err (!%p138_p6)
}
  0x3a   :  { %s142_s20 = scalar_lea.hbm %s231_s3, 256 }
  0x3b   :  { %p143_p7 = scmp.ne.s32.totalorder %s231_s3, %s142_s20  ;;  %p146_p8 = scmp.lt.u32.totalorder %s142_s20, %s231_s3 }
  0x3d   :  { %p148_p9 = pnand %p146_p8, %p143_p7 }
  0x3f   :  { %151 = shalt.err (!%p148_p9)
}
  0x40   :  { %72 = dma.vmem_to_hbm [thread:$0]  %s67_s17, 256, %s231_s3, [#allocation7], %s161_s8, %s161_s8, %s162_s9  }
  0x41   :  { %156 = dma.done.wait [#allocation7], 256  }
  0x42   :  { %157 = vsyncadd [#allocation7], 4294967040 }
  0x43   :  { %76 = vsyncpa [#allocation6], 1 }
  0x44   :  { %77 = vsyncpa [#allocation7], 1 }

</bundles_post_ra>
